<compile_context>
chip_gen: v7x
topology: tpu7x:2x2x1
jax: 0.10.0
libtpu: 0.0.40
codegen_flags: <defaults>
</compile_context>

<pallas_src>
import functools
import math

import jax
import jax.numpy as jnp
from jax import lax
from jax.experimental import pallas as pl
from jax.experimental.pallas import tpu as pltpu

REGRESSION = "categorical_prob"   # -> softmax(dim=1) branch of the PyTorch module
TOTAL_CLASSES = 10


# ----------------------------------------------------------------------------
# Small helpers
# ----------------------------------------------------------------------------
def _round_up(x, m):
    return (x + m - 1) // m * m


def _pad2(x, rows, cols):
    pr, pc = rows - x.shape[0], cols - x.shape[1]
    if pr == 0 and pc == 0:
        return x
    return jnp.pad(x, ((0, pr), (0, pc)))


# ----------------------------------------------------------------------------
# Pallas kernels
# ----------------------------------------------------------------------------
def _matmul_bias_kernel(a_ref, b_ref, c_ref, o_ref, *, relu):
    """o = act(A @ B + bias). bf16 MXU inputs, f32 accumulation + f32 epilogue."""
    y = jnp.dot(a_ref[...], b_ref[...], preferred_element_type=jnp.float32)
    y = y + c_ref[...]
    if relu:
        y = jnp.maximum(y, 0.0)
    o_ref[...] = y.astype(o_ref.dtype)


def _softmax_kernel(x_ref, o_ref, *, n_valid):
    x = x_ref[...]
    cols = lax.broadcasted_iota(jnp.int32, x.shape, 1)
    mask = cols < n_valid
    x = jnp.where(mask, x, -jnp.inf)
    m = jnp.max(x, axis=1, keepdims=True)
    e = jnp.where(mask, jnp.exp(x - m), 0.0)
    o_ref[...] = e / jnp.sum(e, axis=1, keepdims=True)


def _pick_tm(M):
    """Row tile + padded M. Always >=2 row blocks so v7x megacore has work."""
    if M <= 512:
        Mp = _round_up(M, 32)
        return Mp // 2, Mp            # multiple of 16 (bf16 sublane packing)
    Mp = _round_up(M, 256)
    return 256, Mp


def _pick_tn(N):
    """Col tile + padded N (lane-dense, 128-multiple output blocks when N > 128)."""
    if N <= 128:
        return N, N                   # full-dim block, no padding
    Np = _round_up(N, 128)
    for tn in (512, 384, 256):
        if Np % tn == 0 and Np // tn >= 2:
            return tn, Np
    return 128, Np


@functools.partial(jax.jit, static_argnames=("relu", "out_dtype"))
def matmul_bias(a, b, bias, relu=False, out_dtype=jnp.bfloat16):
    """a: (M, K), b: (K, N) bf16, bias: (N,) f32 -> act(a @ b + bias), (M, N)."""
    M, K = a.shape
    N = b.shape[1]
    TM, Mp = _pick_tm(M)
    TN, Np = _pick_tn(N)
    Kp = _round_up(K, 8)              # every K in this network fits one K block
    a_p = _pad2(a.astype(jnp.bfloat16), Mp, Kp)
    b_p = _pad2(b.astype(jnp.bfloat16), Kp, Np)
    c_p = _pad2(bias.astype(jnp.float32).reshape(1, N), 1, Np)
    grid = (Mp // TM, Np // TN)
    out = pl.pallas_call(
        functools.partial(_matmul_bias_kernel, relu=relu),
        out_shape=jax.ShapeDtypeStruct((Mp, Np), out_dtype),
        grid_spec=pltpu.PrefetchScalarGridSpec(
            num_scalar_prefetch=0,
            grid=grid,
            in_specs=[
                pl.BlockSpec((TM, Kp), lambda i, j: (i, 0)),
                pl.BlockSpec((Kp, TN), lambda i, j: (0, j)),
                pl.BlockSpec((1, TN), lambda i, j: (0, j)),
            ],
            out_specs=pl.BlockSpec((TM, TN), lambda i, j: (i, j)),
        ),
        compiler_params=pltpu.CompilerParams(
            dimension_semantics=("parallel", "parallel")),
    )(a_p, b_p, c_p)
    return out[:M, :N]


@jax.jit
def softmax_dim1(x):
    B, N = x.shape
    Bp, Np = _round_up(B, 8), _round_up(N, 128)
    out = pl.pallas_call(
        functools.partial(_softmax_kernel, n_valid=N),
        out_shape=jax.ShapeDtypeStruct((Bp, Np), jnp.float32),
    )(_pad2(x.astype(jnp.float32), Bp, Np))
    return out[:B, :N]


# ----------------------------------------------------------------------------
# Glue: NHWC im2col and local pooling windows
# ----------------------------------------------------------------------------
def im2col_nhwc(x, kh, kw, stride, padding):
    """x: (B, H, W, C) -> patches (B*OH*OW, kh*kw*C), channel minor (lane-dense)."""
    B, H, W, C = x.shape
    ph, pw = padding
    if kh == 1 and kw == 1 and stride == 1 and ph == 0 and pw == 0:
        return x.reshape(B * H * W, C), (B, H, W)        # 1x1 conv: no im2col at all
    xp = jnp.pad(x, ((0, 0), (ph, ph), (pw, pw), (0, 0)))
    OH = (H + 2 * ph - kh) // stride + 1
    OW = (W + 2 * pw - kw) // stride + 1
    # TODO(synk): multi-tap patches are still materialized in HBM (kh*kw-fold
    # duplication); gathering the taps inside the kernel would need manual per-tap DMA.
    taps = []
    for di in range(kh):
        for dj in range(kw):
            taps.append(xp[:, di:di + (OH - 1) * stride + 1:stride,
                              dj:dj + (OW - 1) * stride + 1:stride, :])
    p = jnp.stack(taps, axis=3)                           # (B, OH, OW, kh*kw, C)
    return p.reshape(B * OH * OW, kh * kw * C), (B, OH, OW)


def max_pool_3x3_s2(x):
    return lax.reduce_window(x, jnp.array(-jnp.inf, x.dtype), lax.max,
                             (1, 3, 3, 1), (1, 2, 2, 1), "VALID")


def avg_pool_3x3_s1_p1(x):
    s = lax.reduce_window(x, jnp.array(0.0, x.dtype), lax.add,
                          (1, 3, 3, 1), (1, 1, 1, 1),
                          ((0, 0), (1, 1), (1, 1), (0, 0)))
    return (s * (1.0 / 9.0)).astype(x.dtype)   # F.avg_pool2d: count_include_pad=True


# ----------------------------------------------------------------------------
# Deterministic synthetic parameters
# ----------------------------------------------------------------------------
class ParamGen:
    def __init__(self, key):
        self.key = key
        self.count = 0

    def _next(self):
        k = jax.random.fold_in(self.key, self.count)
        self.count += 1
        return k

    def normal(self, shape, std):
        return std * jax.random.normal(self._next(), shape, dtype=jnp.float32)

    def uniform(self, shape, lo, hi):
        return jax.random.uniform(self._next(), shape, dtype=jnp.float32,
                                  minval=lo, maxval=hi)


# ----------------------------------------------------------------------------
# Inception-v3 building blocks (torchvision.models.Inception3 topology)
# ----------------------------------------------------------------------------
class BasicConv2d:
    """Conv2d(bias=False) + BatchNorm(eps=1e-3, folded into W/bias) + ReLU."""

    def __init__(self, pg, in_c, out_c, kernel_size, stride=1, padding=0):
        kh, kw = kernel_size if isinstance(kernel_size, tuple) else (kernel_size,) * 2
        ph, pw = padding if isinstance(padding, tuple) else (padding,) * 2
        self.kh, self.kw, self.stride, self.pad = kh, kw, stride, (ph, pw)
        self.out_c = out_c
        fan_in = in_c * kh * kw
        w = pg.normal((kh * kw * in_c, out_c), std=math.sqrt(2.0 / fan_in))
        gamma = pg.uniform((out_c,), 0.9, 1.1)
        beta = pg.normal((out_c,), 0.02)
        mean = pg.normal((out_c,), 0.02)
        var = pg.uniform((out_c,), 0.9, 1.1)
        inv = gamma / jnp.sqrt(var + 1e-3)
        self.w = (w * inv[None, :]).astype(jnp.bfloat16)   # BN scale folded into W
        self.bias = (beta - mean * inv).astype(jnp.float32)

    def __call__(self, x):                                 # x: NHWC bf16
        a, (B, OH, OW) = im2col_nhwc(x, self.kh, self.kw, self.stride, self.pad)
        y = matmul_bias(a, self.w, self.bias, relu=True)
        return y.reshape(B, OH, OW, self.out_c)


def _fuse_1x1(convs):
    """Concatenate sibling 1x1 convs' (K, N) weights / biases along N at init."""
    w = jnp.concatenate([c.w for c in convs], axis=1)
    b = jnp.concatenate([c.bias for c in convs], axis=0)
    return w, b, [c.out_c for c in convs]


def _apply_fused_1x1(x, w, b, sizes):
    B, H, W, C = x.shape
    y = matmul_bias(x.reshape(B * H * W, C), w, b, relu=True)
    y = y.reshape(B, H, W, sum(sizes))
    outs, off = [], 0
    for s in sizes:
        outs.append(y[..., off:off + s])
        off += s
    return outs


class InceptionA:
    def __init__(self, pg, in_c, pool_features):
        b1 = BasicConv2d(pg, in_c, 64, 1)
        b5_1 = BasicConv2d(pg, in_c, 48, 1)
        d1 = BasicConv2d(pg, in_c, 64, 1)
        self.fw, self.fb, self.fsz = _fuse_1x1([b1, b5_1, d1])
        self.b5_2 = BasicConv2d(pg, 48, 64, 5, padding=2)
        self.d2 = BasicConv2d(pg, 64, 96, 3, padding=1)
        self.d3 = BasicConv2d(pg, 96, 96, 3, padding=1)
        self.bp = BasicConv2d(pg, in_c, pool_features, 1)

    def __call__(self, x):
        b1, b5, d = _apply_fused_1x1(x, self.fw, self.fb, self.fsz)
        return jnp.concatenate([
            b1,
            self.b5_2(b5),
            self.d3(self.d2(d)),
            self.bp(avg_pool_3x3_s1_p1(x)),
        ], axis=-1)


class InceptionB:
    def __init__(self, pg, in_c):
        self.b3 = BasicConv2d(pg, in_c, 384, 3, stride=2)
        self.d1 = BasicConv2d(pg, in_c, 64, 1)
        self.d2 = BasicConv2d(pg, 64, 96, 3, padding=1)
        self.d3 = BasicConv2d(pg, 96, 96, 3, stride=2)

    def __call__(self, x):
        return jnp.concatenate([
            self.b3(x),
            self.d3(self.d2(self.d1(x))),
            max_pool_3x3_s2(x),
        ], axis=-1)


class InceptionC:
    def __init__(self, pg, in_c, c7):
        b1 = BasicConv2d(pg, in_c, 192, 1)
        b7_1 = BasicConv2d(pg, in_c, c7, 1)
        d1 = BasicConv2d(pg, in_c, c7, 1)
        self.fw, self.fb, self.fsz = _fuse_1x1([b1, b7_1, d1])
        self.b7_2 = BasicConv2d(pg, c7, c7, (1, 7), padding=(0, 3))
        self.b7_3 = BasicConv2d(pg, c7, 192, (7, 1), padding=(3, 0))
        self.d2 = BasicConv2d(pg, c7, c7, (7, 1), padding=(3, 0))
        self.d3 = BasicConv2d(pg, c7, c7, (1, 7), padding=(0, 3))
        self.d4 = BasicConv2d(pg, c7, c7, (7, 1), padding=(3, 0))
        self.d5 = BasicConv2d(pg, c7, 192, (1, 7), padding=(0, 3))
        self.bp = BasicConv2d(pg, in_c, 192, 1)

    def __call__(self, x):
        b1, b7, d = _apply_fused_1x1(x, self.fw, self.fb, self.fsz)
        return jnp.concatenate([
            b1,
            self.b7_3(self.b7_2(b7)),
            self.d5(self.d4(self.d3(self.d2(d)))),
            self.bp(avg_pool_3x3_s1_p1(x)),
        ], axis=-1)


class InceptionD:
    def __init__(self, pg, in_c):
        b3_1 = BasicConv2d(pg, in_c, 192, 1)
        b7_1 = BasicConv2d(pg, in_c, 192, 1)
        self.fw, self.fb, self.fsz = _fuse_1x1([b3_1, b7_1])
        self.b3_2 = BasicConv2d(pg, 192, 320, 3, stride=2)
        self.b7_2 = BasicConv2d(pg, 192, 192, (1, 7), padding=(0, 3))
        self.b7_3 = BasicConv2d(pg, 192, 192, (7, 1), padding=(3, 0))
        self.b7_4 = BasicConv2d(pg, 192, 192, 3, stride=2)

    def __call__(self, x):
        b3, b7 = _apply_fused_1x1(x, self.fw, self.fb, self.fsz)
        return jnp.concatenate([
            self.b3_2(b3),
            self.b7_4(self.b7_3(self.b7_2(b7))),
            max_pool_3x3_s2(x),
        ], axis=-1)


class InceptionE:
    def __init__(self, pg, in_c):
        b1 = BasicConv2d(pg, in_c, 320, 1)
        b3_1 = BasicConv2d(pg, in_c, 384, 1)
        d1 = BasicConv2d(pg, in_c, 448, 1)
        self.fw, self.fb, self.fsz = _fuse_1x1([b1, b3_1, d1])
        self.b3_2a = BasicConv2d(pg, 384, 384, (1, 3), padding=(0, 1))
        self.b3_2b = BasicConv2d(pg, 384, 384, (3, 1), padding=(1, 0))
        self.d2 = BasicConv2d(pg, 448, 384, 3, padding=1)
        self.d3a = BasicConv2d(pg, 384, 384, (1, 3), padding=(0, 1))
        self.d3b = BasicConv2d(pg, 384, 384, (3, 1), padding=(1, 0))
        self.bp = BasicConv2d(pg, in_c, 192, 1)

    def __call__(self, x):
        b1, b3, d = _apply_fused_1x1(x, self.fw, self.fb, self.fsz)
        b3 = jnp.concatenate([self.b3_2a(b3), self.b3_2b(b3)], axis=-1)
        d = self.d2(d)
        d = jnp.concatenate([self.d3a(d), self.d3b(d)], axis=-1)
        return jnp.concatenate([b1, b3, d, self.bp(avg_pool_3x3_s1_p1(x))], axis=-1)


class Inception3:
    def __init__(self, pg, num_classes):
        self.c1a = BasicConv2d(pg, 3, 32, 3, stride=2)
        self.c2a = BasicConv2d(pg, 32, 32, 3)
        self.c2b = BasicConv2d(pg, 32, 64, 3, padding=1)
        self.c3b = BasicConv2d(pg, 64, 80, 1)
        self.c4a = BasicConv2d(pg, 80, 192, 3)
        self.m5b = InceptionA(pg, 192, 32)
        self.m5c = InceptionA(pg, 256, 64)
        self.m5d = InceptionA(pg, 288, 64)
        self.m6a = InceptionB(pg, 288)
        self.m6b = InceptionC(pg, 768, 128)
        self.m6c = InceptionC(pg, 768, 160)
        self.m6d = InceptionC(pg, 768, 160)
        self.m6e = InceptionC(pg, 768, 192)
        # TODO(synk): AuxLogits head omitted — it only feeds the training loss; the
        # wrapper takes `out.logits` (the main head), which is what we compute here.
        self.m7a = InceptionD(pg, 768)
        self.m7b = InceptionE(pg, 1280)
        self.m7c = InceptionE(pg, 2048)
        self.num_classes = num_classes
        self.fc_w = pg.normal((2048, num_classes),
                              std=math.sqrt(1.0 / 2048)).astype(jnp.bfloat16)
        self.fc_b = pg.normal((num_classes,), 0.01)

    def __call__(self, x):                         # x: NHWC bf16
        x = self.c1a(x)
        x = self.c2a(x)
        x = self.c2b(x)
        x = max_pool_3x3_s2(x)
        x = self.c3b(x)
        x = self.c4a(x)
        x = max_pool_3x3_s2(x)
        x = self.m5b(x); x = self.m5c(x); x = self.m5d(x)
        x = self.m6a(x)
        x = self.m6b(x); x = self.m6c(x); x = self.m6d(x); x = self.m6e(x)
        x = self.m7a(x); x = self.m7b(x); x = self.m7c(x)
        # Adaptive average pool to 1x1 folded into the FC matmul:
        #   mean_hw(x) @ W == x.reshape(B, hw*C) @ tile(W * (1/hw), (hw, 1))
        B, H, W, C = x.shape
        hw = H * W
        a = x.reshape(B, hw * C)
        w_eff = jnp.tile(self.fc_w * (1.0 / hw), (hw, 1))
        # TODO(synk): dropout treated as identity (inference semantics).
        logits = matmul_bias(a, w_eff, self.fc_b, relu=False, out_dtype=jnp.float32)
        return logits


class Inception:
    """Mirrors the PyTorch wrapper: Inception3 backbone + head nonlinearity."""

    def __init__(self, key):
        pg = ParamGen(key)
        n_out = 1 if REGRESSION == "continuous" else TOTAL_CLASSES
        self.inception = Inception3(pg, n_out)

    def __call__(self, x):                         # x: (B, 3, H, W) f32 (PyTorch layout)
        x = jnp.transpose(x, (0, 2, 3, 1)).astype(jnp.bfloat16)   # NHWC, bf16 once
        out = self.inception(x)                    # main-head logits, f32
        if REGRESSION == "continuous":
            return jnp.squeeze(out, -1)
        elif REGRESSION in ("categorical_abs", "categorical_prob"):
            return softmax_dim1(out)               # Pallas softmax over dim=1
        else:
            return jax.nn.sigmoid(out)             # (unused for chosen REGRESSION)


if __name__ == "__main__":
    key = jax.random.PRNGKey(0)
    pkey, xkey = jax.random.split(key)
    model = Inception(pkey)
    # Canonical Inception-v3 input is 299x299; 128x128 is the small test size here
    # (every stride-2 stage still keeps spatial size >= 1).
    x = jax.random.normal(xkey, (2, 3, 128, 128), dtype=jnp.float32)
    preds = jax.block_until_ready(model(x))
    assert preds.shape == (2, TOTAL_CLASSES)
    assert bool(jnp.all(jnp.isfinite(preds)))
    assert bool(jnp.allclose(jnp.sum(preds, axis=1), 1.0, atol=1e-4))
    print("KERNEL_OK")
</pallas_src>

<mosaic_0001>
module attributes {stable_mosaic.version = 11 : i64} {
  func.func @_matmul_bias_kernel(%arg0: i32, %arg1: i32, %arg2: memref<256x32xbf16, #tpu.memory_space<vmem>>, %arg3: memref<32x32xbf16, #tpu.memory_space<vmem>>, %arg4: memref<1x32xf32, #tpu.memory_space<vmem>>, %arg5: memref<256x32xbf16, #tpu.memory_space<vmem>>) attributes {dimension_semantics = [#tpu.dimension_semantics<parallel>, #tpu.dimension_semantics<parallel>], iteration_bounds = array<i64: 32, 1>, scalar_prefetch = 0 : i64, scratch_operands = 0 : i64, tpu.core_type = #tpu.core_type<tc>, window_params = [{transform_indices = @transform_0, window_bounds = array<i64: 256, 32>}, {transform_indices = @transform_1, window_bounds = array<i64: 32, 32>}, {transform_indices = @transform_2, window_bounds = array<i64: 1, 32>}, {transform_indices = @transform_3, window_bounds = array<i64: 256, 32>}]} {
    %c0 = arith.constant 0 : index
    %c0_0 = arith.constant 0 : index
    %0 = vector.load %arg2[%c0, %c0_0] : memref<256x32xbf16, #tpu.memory_space<vmem>>, vector<256x32xbf16>
    %c0_1 = arith.constant 0 : index
    %c0_2 = arith.constant 0 : index
    %1 = vector.load %arg3[%c0_1, %c0_2] : memref<32x32xbf16, #tpu.memory_space<vmem>>, vector<32x32xbf16>
    %cst = arith.constant dense<0.000000e+00> : vector<256x32xf32>
    %2 = tpu.matmul %0, %1, %cst {dimension_numbers = #tpu.dot_dimension_numbers<[1], [0], [0], [1], [0, 0, 1, 1], [], []>} : vector<256x32xbf16>, vector<32x32xbf16>, vector<256x32xf32> -> vector<256x32xf32>
    %c0_3 = arith.constant 0 : index
    %c0_4 = arith.constant 0 : index
    %3 = vector.load %arg4[%c0_3, %c0_4] : memref<1x32xf32, #tpu.memory_space<vmem>>, vector<1x32xf32>
    %4 = vector.broadcast %3 : vector<1x32xf32> to vector<256x32xf32>
    %5 = arith.addf %2, %4 : vector<256x32xf32>
    %cst_5 = arith.constant 0.000000e+00 : f32
    %6 = vector.broadcast %cst_5 : f32 to vector<256x32xf32>
    %7 = arith.maximumf %5, %6 : vector<256x32xf32>
    %8 = arith.truncf %7 : vector<256x32xf32> to vector<256x32xbf16>
    %c0_6 = arith.constant 0 : index
    %c0_7 = arith.constant 0 : index
    %9 = vector.load %arg5[%c0_6, %c0_7] : memref<256x32xbf16, #tpu.memory_space<vmem>>, vector<256x32xbf16>
    tpu.vector_store %arg5[%c0_6, %c0_7], %8 {strides = array<i32>} : memref<256x32xbf16, #tpu.memory_space<vmem>>, vector<256x32xbf16>,
    return
  }
  func.func @transform_0(%arg0: i32, %arg1: i32) -> (i32, i32) {
    %c0_i32 = arith.constant 0 : i32
    %c0_i32_0 = arith.constant 0 : i32
    return %arg0, %c0_i32 : i32, i32
  }
  func.func @transform_1(%arg0: i32, %arg1: i32) -> (i32, i32) {
    %c0_i32 = arith.constant 0 : i32
    %c0_i32_0 = arith.constant 0 : i32
    return %c0_i32, %arg1 : i32, i32
  }
  func.func @transform_2(%arg0: i32, %arg1: i32) -> (i32, i32) {
    %c0_i32 = arith.constant 0 : i32
    %c0_i32_0 = arith.constant 0 : i32
    return %c0_i32, %arg1 : i32, i32
  }
  func.func @transform_3(%arg0: i32, %arg1: i32) -> (i32, i32) {
    %c0_i32 = arith.constant 0 : i32
    return %arg0, %arg1 : i32, i32
  }
}

</mosaic_0001>

<bundles_post_ra>
// kernel: matmul_bias.1
= control target key start
LH: loop header
LB: loop body
LE: loop exit
PB: predicated region body
PF: predicated region fallthrough
CT: control target
= control target key end

     0   :  { %s1122_s12 = smov 0   ;;  %s1124_s13 = smov 0   ;;  %s1305_s0 = inlined_call_operand.vmem [shape: bf16[8192,32], index: 0, kind: input, shape index: {}]   ;;  %s1306_s1 = inlined_call_operand.vmem [shape: bf16[32,32], index: 1, kind: input, shape index: {}]   ;;  %s1307_s2 = inlined_call_operand.vmem [shape: f32[1,32], index: 2, kind: input, shape index: {}]   ;;  %s1308_s3 = inlined_call_operand.vmem [shape: bf16[8192,32], index: 3, kind: output, shape index: {}]  }
   0x1   :  { %s1126_s14 = smov 0  }
   0x2 LB: > { %s25_s15 = sadd.s32 1, %s1096_s13  ;;  %p872_p0 = scmp.ge.s32.totalorder %s1100_s14, 1  ;;  %s1100_s14 = sphi %s1126_s14, %s13_s14   ;;  %s1096_s13 = sphi %s1124_s13, %s1310_s13   ;;  %s1092_s12 = sphi %s1122_s12, %s1309_s12  }
   0x3   : > { %p27_p1 = scmp.ge.s32.totalorder %s25_s15, 32  ;;  %p169_p2 = scmp.lt.s32.totalorder %s1100_s14, 33 }
   0x5   : > { %s1312_s15 = smov (%p27_p1, %s25_s15), 0  ;;  %p170_p3 = pnand %p872_p0, %p169_p2 }
   0x6   : > { %v1060_v0 = vld [vmem:[%s1306_s1] sm:$0xff] (!%p170_p3)   ;;  %s873_s18 = sshll.u32 (!%p170_p3), %s1092_s12, 5  ;;  %v1061_v1 = vld [vmem:[%s1306_s1 + $0x8] sm:$0xff] (!%p170_p3)   ;;  %vm361_vm0 = vcmask (!%p170_p3), 261120   ;;  %vm731_vm1 = vcmask (!%p170_p3), 257024  }
   0x7   : > { %173 = sbr.rel (%p170_p3) target bundleno = 266 (0x10a), region = 32  ;;  %p204_p4 = scmp.lt.s32.totalorder (!%p170_p3), %s873_s18, 1023  ;;  %996 = vmatprep.subr.bf16.mxu0 (!%p170_p3), %v1060_v0  ;;  %1032 = vmatprep.subr.bf16.mxu1 (!%p170_p3), %v1060_v0  ;;  %v1191_v18 = vld [vmem:[%s1307_s2] ss:$0 sm:$0xff] (!%p170_p3) }
   0x8   : > { %997 = vmatpush3.bf16.msra.mxu0 (!%p170_p3), %v1060_v0  ;;  %1034 = vmatpush3.bf16.msra.mxu1 (!%p170_p3), %v1060_v0 }
   0x9   : > { %998 = vmatprep.subr.bf16.mxu0 (!%p170_p3), %v1061_v1  ;;  %1033 = vmatprep.subr.bf16.mxu1 (!%p170_p3), %v1061_v1 }
   0xc   : > { %999 = vmatpush3.bf16.msra.mxu0 (!%p170_p3), %v1061_v1  ;;  %1035 = vmatpush3.bf16.msra.mxu1 (!%p170_p3), %v1061_v1 }
   0xe   : > { %s1314_s18 = smov (!%p204_p4, %s873_s18), 1023 }
   0xf   : > { %s874_s21 = sshll.u32 %s1314_s18, 2 }
  0x10   : > { %s1154_s24 = scalar_lea.vmem %s1305_s0, %s874_s21  ;;  %s1203_s29 = scalar_lea.vmem %s1308_s3, %s874_s21 }
  0x11   : > { %v1062_v2 = vld [vmem:[%s1154_s24] sm:$0xff]   ;;  %v1064_v4 = vld [vmem:[%s1154_s24 + $0x8] sm:$0xff]   ;;  %v1066_v6 = vld [vmem:[%s1154_s24 + $0x10] sm:$0xff]  }
  0x12   : > { %v1063_v3 = vld [vmem:[%s1154_s24 + $0x40] sm:$0xff]   ;;  %1000 = vmatprep.mubr.msk.bf16.mxu0 %vm361_vm0, %v1062_v2  ;;  %v1065_v5 = vld [vmem:[%s1154_s24 + $0x48] sm:$0xff]   ;;  %v1067_v7 = vld [vmem:[%s1154_s24 + $0x50] sm:$0xff]  }
  0x13   : > { %1016 = vmatprep.mubr.msk.bf16.mxu1 %vm361_vm0, %v1063_v3  ;;  %1001 = vmatmul.mubr.msk.bf16.vlgmr.msra.gmra.mrb[0].mxu0 %vm361_vm0, %v1064_v4  ;;  %v1068_v8 = vld [vmem:[%s1154_s24 + $0x18] sm:$0xff]   ;;  %v1070_v10 = vld [vmem:[%s1154_s24 + $0x20] sm:$0xff]   ;;  %v1072_v12 = vld [vmem:[%s1154_s24 + $0x28] sm:$0xff]  }
  0x14   : > { %1017 = vmatmul.mubr.msk.bf16.vlgmr.msra.gmra.mrb[0].mxu1 %vm361_vm0, %v1065_v5  ;;  %1004 = vmatprep.mubr.msk.bf16.mxu0 %vm361_vm0, %v1066_v6  ;;  %v1069_v9 = vld [vmem:[%s1154_s24 + $0x58] sm:$0xff]   ;;  %v1071_v11 = vld [vmem:[%s1154_s24 + $0x60] sm:$0xff]   ;;  %v1073_v13 = vld [vmem:[%s1154_s24 + $0x68] sm:$0xff]  }
  0x15   : > { %1020 = vmatprep.mubr.msk.bf16.mxu1 %vm361_vm0, %v1067_v7  ;;  %v1074_v14 = vld [vmem:[%s1154_s24 + $0x30] sm:$0xff]   ;;  %v1076_v16 = vld [vmem:[%s1154_s24 + $0x38] sm:$0xff]  }
  0x16   : > { %v1075_v15 = vld [vmem:[%s1154_s24 + $0x70] sm:$0xff]   ;;  %v1077_v17 = vld [vmem:[%s1154_s24 + $0x78] sm:$0xff]  }
  0x1b   : > { %1005 = vmatmul.mubr.msk.bf16.gmra.mrb[4].mxu0 %vm361_vm0, %v1068_v8 }
  0x1c   : > { %1021 = vmatmul.mubr.msk.bf16.gmra.mrb[4].mxu1 %vm361_vm0, %v1069_v9  ;;  %1008 = vmatprep.mubr.msk.bf16.mxu0 %vm361_vm0, %v1070_v10 }
  0x1d   : > { %1024 = vmatprep.mubr.msk.bf16.mxu1 %vm361_vm0, %v1071_v11 }
  0x23   : > { %1009 = vmatmul.mubr.msk.bf16.gmra.mrb[8].mxu0 %vm361_vm0, %v1072_v12 }
  0x24   : > { %1025 = vmatmul.mubr.msk.bf16.gmra.mrb[8].mxu1 %vm361_vm0, %v1073_v13  ;;  %1012 = vmatprep.mubr.msk.bf16.mxu0 %vm361_vm0, %v1074_v14 }
  0x25   : > { %1028 = vmatprep.mubr.msk.bf16.mxu1 %vm361_vm0, %v1075_v15 }
  0x2b   : > { %1013 = vmatmul.mubr.msk.bf16.gmra.mrb[12].mxu0 %vm361_vm0, %v1076_v16 }
  0x2c   : > { %1029 = vmatmul.mubr.msk.bf16.gmra.mrb[12].mxu1 %vm361_vm0, %v1077_v17 }
  0xe6   : > { %v1002_v19 = vpop.f32.mrb[0].mxu0 }
  0xe7   : > { %v453_v20 = vadd.f32 %v1002_v19, %v1191_v18  ;;  %v1018_v21 = vpop.f32.mrb[0].mxu1  ;;  %v444_v22 = vpop.f32.mrb[1].mxu0 }
  0xe8   : > { %v517_v23 = vadd.f32 %v1018_v21, %v1191_v18  ;;  %v445_v24 = vadd.f32 %v1191_v18, %v444_v22  ;;  %v508_v25 = vpop.f32.mrb[1].mxu1  ;;  %v1003_v26 = vpop.f32.mrb[2].mxu0 }
  0xe9   : > { %v573_v27 = vmax.f32 %v453_v20, 0.0  ;;  %v509_v28 = vadd.f32 %v1191_v18, %v508_v25  ;;  %v456_v29 = vadd.f32 %v1003_v26, %v1191_v18  ;;  %v1019_v30 = vpop.f32.mrb[2].mxu1  ;;  %v447_v31 = vpop.f32.mrb[3].mxu0 }
  0xea   : > { %v589_v32 = vmax.f32 %v517_v23, 0.0  ;;  %v571_v33 = vmax.f32 %v445_v24, 0.0  ;;  %v520_v34 = vadd.f32 %v1019_v30, %v1191_v18  ;;  %v448_v35 = vadd.f32 %v1191_v18, %v447_v31  ;;  %v511_v36 = vpop.f32.mrb[3].mxu1 }
  0xeb   : > { %v948_v37 = vpack.c.bf16 %v573_v27, %v573_v27  ;;  %v587_v38 = vmax.f32 %v509_v28, 0.0  ;;  %v574_v39 = vmax.f32 %v456_v29, 0.0  ;;  %v512_v40 = vadd.f32 %v1191_v18, %v511_v36 }
  0xec   : > { %v964_v41 = vpack.c.bf16 %v589_v32, %v589_v32  ;;  %v946_v42 = vpack.c.bf16 %v571_v33, %v571_v33  ;;  %v590_v43 = vmax.f32 %v520_v34, 0.0  ;;  %v572_v44 = vmax.f32 %v448_v35, 0.0 }
  0xed   : > { %734 = vst.msk [vmem:[%s1203_s29 + $0x8] sm:$0xf] %vm731_vm1, %v948_v37  ;;  %v962_v45 = vpack.c.bf16 %v587_v38, %v587_v38  ;;  %v949_v46 = vpack.c.bf16 %v574_v39, %v574_v39  ;;  %v588_v47 = vmax.f32 %v512_v40, 0.0 }
  0xee   : > { %750 = vst.msk [vmem:[%s1203_s29 + $0x48] sm:$0xf] %vm731_vm1, %v964_v41  ;;  %732 = vst.msk [vmem:[%s1203_s29] sm:$0xf] %vm731_vm1, %v946_v42  ;;  %v965_v48 = vpack.c.bf16 %v590_v43, %v590_v43  ;;  %v947_v49 = vpack.c.bf16 %v572_v44, %v572_v44  ;;  %v1006_v50 = vpop.f32.mrb[4].mxu0 }
  0xef   : > { %748 = vst.msk [vmem:[%s1203_s29 + $0x40] sm:$0xf] %vm731_vm1, %v962_v45  ;;  %735 = vst.msk [vmem:[%s1203_s29 + $0xc] sm:$0xf] %vm731_vm1, %v949_v46  ;;  %v963_v51 = vpack.c.bf16 %v588_v47, %v588_v47  ;;  %v469_v52 = vadd.f32 %v1006_v50, %v1191_v18  ;;  %v1022_v53 = vpop.f32.mrb[4].mxu1  ;;  %v460_v54 = vpop.f32.mrb[5].mxu0 }
  0xf0   : > { %751 = vst.msk [vmem:[%s1203_s29 + $0x4c] sm:$0xf] %vm731_vm1, %v965_v48  ;;  %733 = vst.msk [vmem:[%s1203_s29 + $0x4] sm:$0xf] %vm731_vm1, %v947_v49  ;;  %v533_v55 = vadd.f32 %v1022_v53, %v1191_v18  ;;  %v461_v56 = vadd.f32 %v1191_v18, %v460_v54  ;;  %v524_v57 = vpop.f32.mrb[5].mxu1  ;;  %v1007_v58 = vpop.f32.mrb[6].mxu0 }
  0xf1   : > { %749 = vst.msk [vmem:[%s1203_s29 + $0x44] sm:$0xf] %vm731_vm1, %v963_v51  ;;  %v577_v59 = vmax.f32 %v469_v52, 0.0  ;;  %v525_v60 = vadd.f32 %v1191_v18, %v524_v57  ;;  %v472_v61 = vadd.f32 %v1007_v58, %v1191_v18  ;;  %v1023_v62 = vpop.f32.mrb[6].mxu1  ;;  %v463_v63 = vpop.f32.mrb[7].mxu0 }
  0xf2   : > { %v593_v0 = vmax.f32 %v533_v55, 0.0  ;;  %v575_v1 = vmax.f32 %v461_v56, 0.0  ;;  %v536_v2 = vadd.f32 %v1023_v62, %v1191_v18  ;;  %v464_v3 = vadd.f32 %v1191_v18, %v463_v63  ;;  %v527_v4 = vpop.f32.mrb[7].mxu1 }
  0xf3   : > { %v952_v5 = vpack.c.bf16 %v577_v59, %v577_v59  ;;  %v591_v6 = vmax.f32 %v525_v60, 0.0  ;;  %v578_v7 = vmax.f32 %v472_v61, 0.0  ;;  %v528_v8 = vadd.f32 %v1191_v18, %v527_v4 }
  0xf4   : > { %v968_v9 = vpack.c.bf16 %v593_v0, %v593_v0  ;;  %v950_v10 = vpack.c.bf16 %v575_v1, %v575_v1  ;;  %v594_v11 = vmax.f32 %v536_v2, 0.0  ;;  %v576_v12 = vmax.f32 %v464_v3, 0.0 }
  0xf5   : > { %738 = vst.msk [vmem:[%s1203_s29 + $0x18] sm:$0xf] %vm731_vm1, %v952_v5  ;;  %v966_v13 = vpack.c.bf16 %v591_v6, %v591_v6  ;;  %v953_v14 = vpack.c.bf16 %v578_v7, %v578_v7  ;;  %v592_v15 = vmax.f32 %v528_v8, 0.0 }
  0xf6   : > { %754 = vst.msk [vmem:[%s1203_s29 + $0x58] sm:$0xf] %vm731_vm1, %v968_v9  ;;  %736 = vst.msk [vmem:[%s1203_s29 + $0x10] sm:$0xf] %vm731_vm1, %v950_v10  ;;  %v969_v16 = vpack.c.bf16 %v594_v11, %v594_v11  ;;  %v951_v17 = vpack.c.bf16 %v576_v12, %v576_v12  ;;  %v1010_v19 = vpop.f32.mrb[8].mxu0 }
  0xf7   : > { %752 = vst.msk [vmem:[%s1203_s29 + $0x50] sm:$0xf] %vm731_vm1, %v966_v13  ;;  %739 = vst.msk [vmem:[%s1203_s29 + $0x1c] sm:$0xf] %vm731_vm1, %v953_v14  ;;  %v967_v20 = vpack.c.bf16 %v592_v15, %v592_v15  ;;  %v485_v21 = vadd.f32 %v1010_v19, %v1191_v18  ;;  %v1026_v22 = vpop.f32.mrb[8].mxu1  ;;  %v476_v23 = vpop.f32.mrb[9].mxu0 }
  0xf8   : > { %755 = vst.msk [vmem:[%s1203_s29 + $0x5c] sm:$0xf] %vm731_vm1, %v969_v16  ;;  %737 = vst.msk [vmem:[%s1203_s29 + $0x14] sm:$0xf] %vm731_vm1, %v951_v17  ;;  %v549_v24 = vadd.f32 %v1026_v22, %v1191_v18  ;;  %v477_v25 = vadd.f32 %v1191_v18, %v476_v23  ;;  %v540_v26 = vpop.f32.mrb[9].mxu1  ;;  %v1011_v27 = vpop.f32.mrb[10].mxu0 }
  0xf9   : > { %753 = vst.msk [vmem:[%s1203_s29 + $0x54] sm:$0xf] %vm731_vm1, %v967_v20  ;;  %v581_v28 = vmax.f32 %v485_v21, 0.0  ;;  %v541_v29 = vadd.f32 %v1191_v18, %v540_v26  ;;  %v488_v30 = vadd.f32 %v1011_v27, %v1191_v18  ;;  %v1027_v31 = vpop.f32.mrb[10].mxu1  ;;  %v479_v32 = vpop.f32.mrb[11].mxu0 }
  0xfa   : > { %v597_v33 = vmax.f32 %v549_v24, 0.0  ;;  %v579_v34 = vmax.f32 %v477_v25, 0.0  ;;  %v552_v35 = vadd.f32 %v1027_v31, %v1191_v18  ;;  %v480_v36 = vadd.f32 %v1191_v18, %v479_v32  ;;  %v543_v37 = vpop.f32.mrb[11].mxu1 }
  0xfb   : > { %v956_v38 = vpack.c.bf16 %v581_v28, %v581_v28  ;;  %v595_v39 = vmax.f32 %v541_v29, 0.0  ;;  %v582_v40 = vmax.f32 %v488_v30, 0.0  ;;  %v544_v41 = vadd.f32 %v1191_v18, %v543_v37 }
  0xfc   : > { %v972_v42 = vpack.c.bf16 %v597_v33, %v597_v33  ;;  %v954_v43 = vpack.c.bf16 %v579_v34, %v579_v34  ;;  %v598_v44 = vmax.f32 %v552_v35, 0.0  ;;  %v580_v45 = vmax.f32 %v480_v36, 0.0 }
  0xfd   : > { %742 = vst.msk [vmem:[%s1203_s29 + $0x28] sm:$0xf] %vm731_vm1, %v956_v38  ;;  %v970_v46 = vpack.c.bf16 %v595_v39, %v595_v39  ;;  %v957_v47 = vpack.c.bf16 %v582_v40, %v582_v40  ;;  %v596_v48 = vmax.f32 %v544_v41, 0.0 }
  0xfe   : > { %758 = vst.msk [vmem:[%s1203_s29 + $0x68] sm:$0xf] %vm731_vm1, %v972_v42  ;;  %740 = vst.msk [vmem:[%s1203_s29 + $0x20] sm:$0xf] %vm731_vm1, %v954_v43  ;;  %v973_v49 = vpack.c.bf16 %v598_v44, %v598_v44  ;;  %v955_v50 = vpack.c.bf16 %v580_v45, %v580_v45  ;;  %v1014_v51 = vpop.f32.mrb[12].mxu0 }
  0xff   : > { %756 = vst.msk [vmem:[%s1203_s29 + $0x60] sm:$0xf] %vm731_vm1, %v970_v46  ;;  %743 = vst.msk [vmem:[%s1203_s29 + $0x2c] sm:$0xf] %vm731_vm1, %v957_v47  ;;  %v971_v52 = vpack.c.bf16 %v596_v48, %v596_v48  ;;  %v501_v53 = vadd.f32 %v1014_v51, %v1191_v18  ;;  %v1030_v54 = vpop.f32.mrb[12].mxu1  ;;  %v492_v55 = vpop.f32.mrb[13].mxu0 }
 0x100   : > { %759 = vst.msk [vmem:[%s1203_s29 + $0x6c] sm:$0xf] %vm731_vm1, %v973_v49  ;;  %741 = vst.msk [vmem:[%s1203_s29 + $0x24] sm:$0xf] %vm731_vm1, %v955_v50  ;;  %v565_v56 = vadd.f32 %v1030_v54, %v1191_v18  ;;  %v493_v57 = vadd.f32 %v1191_v18, %v492_v55  ;;  %v556_v58 = vpop.f32.mrb[13].mxu1  ;;  %v1015_v59 = vpop.f32.mrb[14].mxu0 }
 0x101   : > { %757 = vst.msk [vmem:[%s1203_s29 + $0x64] sm:$0xf] %vm731_vm1, %v971_v52  ;;  %v585_v60 = vmax.f32 %v501_v53, 0.0  ;;  %v557_v61 = vadd.f32 %v1191_v18, %v556_v58  ;;  %v504_v62 = vadd.f32 %v1015_v59, %v1191_v18  ;;  %v1031_v63 = vpop.f32.mrb[14].mxu1  ;;  %v495_v0 = vpop.f32.mrb[15].mxu0 }
 0x102   : > { %v601_v1 = vmax.f32 %v565_v56, 0.0  ;;  %v583_v2 = vmax.f32 %v493_v57, 0.0  ;;  %v568_v3 = vadd.f32 %v1031_v63, %v1191_v18  ;;  %v496_v4 = vadd.f32 %v1191_v18, %v495_v0  ;;  %v559_v5 = vpop.f32.mrb[15].mxu1 }
 0x103   : > { %v960_v6 = vpack.c.bf16 %v585_v60, %v585_v60  ;;  %v599_v7 = vmax.f32 %v557_v61, 0.0  ;;  %v586_v8 = vmax.f32 %v504_v62, 0.0  ;;  %v560_v9 = vadd.f32 %v1191_v18, %v559_v5 }
 0x104   : > { %v976_v10 = vpack.c.bf16 %v601_v1, %v601_v1  ;;  %v958_v11 = vpack.c.bf16 %v583_v2, %v583_v2  ;;  %v602_v12 = vmax.f32 %v568_v3, 0.0  ;;  %v584_v13 = vmax.f32 %v496_v4, 0.0 }
 0x105   : > { %746 = vst.msk [vmem:[%s1203_s29 + $0x38] sm:$0xf] %vm731_vm1, %v960_v6  ;;  %v974_v14 = vpack.c.bf16 %v599_v7, %v599_v7  ;;  %v961_v15 = vpack.c.bf16 %v586_v8, %v586_v8  ;;  %v600_v16 = vmax.f32 %v560_v9, 0.0 }
 0x106   : > { %762 = vst.msk [vmem:[%s1203_s29 + $0x78] sm:$0xf] %vm731_vm1, %v976_v10  ;;  %744 = vst.msk [vmem:[%s1203_s29 + $0x30] sm:$0xf] %vm731_vm1, %v958_v11  ;;  %v977_v17 = vpack.c.bf16 %v602_v12, %v602_v12  ;;  %v959_v19 = vpack.c.bf16 %v584_v13, %v584_v13 }
 0x107   : > { %760 = vst.msk [vmem:[%s1203_s29 + $0x70] sm:$0xf] %vm731_vm1, %v974_v14  ;;  %747 = vst.msk [vmem:[%s1203_s29 + $0x3c] sm:$0xf] %vm731_vm1, %v961_v15  ;;  %v975_v18 = vpack.c.bf16 %v600_v16, %v600_v16 }
 0x108   : > { %763 = vst.msk [vmem:[%s1203_s29 + $0x7c] sm:$0xf] %vm731_vm1, %v977_v17  ;;  %745 = vst.msk [vmem:[%s1203_s29 + $0x34] sm:$0xf] %vm731_vm1, %v959_v19 }
 0x109   : > { %761 = vst.msk [vmem:[%s1203_s29 + $0x74] sm:$0xf] %vm731_vm1, %v975_v18 }
 0x10a PF: > { %s13_s14 = sadd.s32 1, %s1100_s14   ;;  %s1309_s12 = smov %s1096_s13 }
 0x10b   : > { %p10_p5 = scmp.ge.s32.totalorder %s13_s14, 34   ;;  %s1310_s13 = smov %s1312_s15 }
 0x10d   :  { %12 = sbr.rel (!%p10_p5) target bundleno = 2 (0x2), region = 68 }

</bundles_post_ra>
